<compile_context>
chip_gen: v7x
topology: tpu7x:2x2x1
jax: 0.10.0
libtpu: 0.0.40
codegen_flags: <defaults>
</compile_context>

<pallas_src>
import math

import jax
import jax.numpy as jnp
from jax.experimental import pallas as pl
from jax.experimental.pallas import tpu as pltpu

LANES = 128


def _round_up(x, m):
    return ((x + m - 1) // m) * m


def _tpu_config():
    """Returns (tensorcores_per_device, vmem_limit_bytes, per_input_block_bytes)."""
    num_cores = 1
    try:
        kind = jax.devices()[0].device_kind.lower()
        # Single-TensorCore-per-device chips: v5e / v6e ("lite") and v2/v3.
        # Multi-TC-per-device chips (v4 / v5p megacore, v7x) get a core axis.
        if not any(tag in kind for tag in ("lite", "v5e", "v6e", "v2", "v3")):
            num_cores = 2
    except Exception:
        num_cores = 1

    try:
        vmem_cap = int(pltpu.get_tpu_info().vmem_capacity_bytes)
    except Exception:
        vmem_cap = 64 * 1024 * 1024          # conservative: v7x per-TC VMEM

    if vmem_cap >= 100 * 1024 * 1024:        # v5e / v6e: 128 MiB physical
        return num_cores, 64 * 1024 * 1024, 4 * 1024 * 1024
    return num_cores, 40 * 1024 * 1024, 3 * 1024 * 1024   # v7x: 64 MiB physical


def _dice_kernel(r_total, tile_r, tiles_per_core, ragged):
    """Streaming partial-sum kernel: accumulates sum(p*t) and sum(p)+sum(t)."""

    def kernel(p_ref, t_ref, o_ref):
        i = pl.program_id(1)

        @pl.when(i == 0)
        def _init():
            o_ref[...] = jnp.zeros_like(o_ref)

        p = p_ref[...].astype(jnp.float32)
        t = t_ref[...].astype(jnp.float32)

        if ragged:
            # The final (partial) block sticks out past the end of the array;
            # its out-of-bounds rows hold garbage, so zero them before they
            # touch the sums (zeros are sum-neutral).
            blk = pl.program_id(0) * tiles_per_core + i
            row0 = blk * tile_r
            rows = row0 + jax.lax.broadcasted_iota(jnp.int32, p.shape, 0)
            valid = rows < r_total
            p = jnp.where(valid, p, 0.0)
            t = jnp.where(valid, t, 0.0)

        # Partial-reduce the streamed block straight into the VMEM-resident
        # output block (its index_map is invariant along the reduction axis).
        # The axis-0 reduces are VPU/XLU work, fully hidden under the input DMA.
        o_ref[0, 0] += jnp.sum(p * t, axis=0, keepdims=True)
        o_ref[0, 1] += (jnp.sum(p, axis=0, keepdims=True)
                        + jnp.sum(t, axis=0, keepdims=True))

    return kernel


@jax.jit
def dice_loss(predicted, target):
    assert predicted.shape == target.shape

    num_cores, vmem_limit, block_budget = _tpu_config()

    isz_p = jnp.dtype(predicted.dtype).itemsize
    isz_t = jnp.dtype(target.dtype).itemsize
    pack = max(8, 32 // min(isz_p, isz_t))   # packed-sublane multiple for dtype

    # ---------------- 2-D streaming view of the inputs ----------------
    if predicted.ndim >= 2:
        r_total = math.prod(predicted.shape[:-1])
        c = predicted.shape[-1]
    else:
        r_total, c = 1, max(predicted.size, 1)

    c_pad = _round_up(max(c, 1), LANES)          # lane-padded VMEM width
    bytes_per_row = c_pad * (isz_p + isz_t)      # both inputs, one pipeline buffer
    tile_r = ((2 * block_budget) // bytes_per_row) // pack * pack

    if tile_r >= pack:
        # Collapsing leading dims (trailing dim unchanged) is layout-preserving
        # on TPU: no relayout / pad copy is issued in front of the kernel.
        p2d = predicted.reshape(r_total, c)
        t2d = target.reshape(r_total, c)
    else:
        # Trailing dim too wide for even one 8-row block: one-off lane-dense
        # relayout (the zero pad is sum-neutral).
        n = predicted.size
        c = LANES
        r_total = pl.cdiv(n, LANES)
        pad = r_total * LANES - n

        def _lane_dense(x):
            flat = jnp.ravel(x)
            if pad:
                flat = jnp.pad(flat, (0, pad))
            return flat.reshape(r_total, LANES)

        p2d, t2d = _lane_dense(predicted), _lane_dense(target)
        bytes_per_row = LANES * (isz_p + isz_t)
        tile_r = max(pack, ((2 * block_budget) // bytes_per_row) // pack * pack)

    # Keep the row-block inside the array (second-minor block dim must be a
    # multiple of 8 or equal to the full dim).
    if r_total >= pack:
        tile_r = min(tile_r, (r_total // pack) * pack)
    else:
        tile_r = r_total
    tiles_total = pl.cdiv(r_total, tile_r)

    # ------- split the row-block range across TensorCores (v4/v5p/v7x) -------
    if num_cores > 1 and tiles_total >= 2 * num_cores:
        tr, tt = tile_r, tiles_total
        # Make the block count divide evenly so no grid step maps to a block
        # that lies entirely past the end of the array.
        while tt % num_cores and tr > pack:
            tr -= pack
            tt = pl.cdiv(r_total, tr)
        if tt % num_cores == 0:
            tile_r, tiles_total = tr, tt
        else:
            num_cores = 1
    else:
        num_cores = 1
    tiles_per_core = tiles_total // num_cores

    ragged = (r_total % tile_r) != 0

    in_spec = pl.BlockSpec(
        (tile_r, c), lambda cc, i, _tpc=tiles_per_core: (cc * _tpc + i, 0)
    )
    out_spec = pl.BlockSpec((1, 2, 1, c), lambda cc, i: (cc, 0, 0, 0))

    partials = pl.pallas_call(
        _dice_kernel(r_total, tile_r, tiles_per_core, ragged),
        out_shape=jax.ShapeDtypeStruct((num_cores, 2, 1, c), jnp.float32),
        grid_spec=pltpu.PrefetchScalarGridSpec(
            num_scalar_prefetch=0,
            grid=(num_cores, tiles_per_core),
            in_specs=[in_spec, in_spec],
            out_specs=out_spec,
        ),
        compiler_params=pltpu.CompilerParams(
            # TODO(synk): confirm in an xprof trace that "parallel" engages both
            # TensorCores on v7x; if not, switch axis 0 to pltpu.CORE_PARALLEL.
            dimension_semantics=("parallel", "arbitrary"),
            vmem_limit_bytes=vmem_limit,
        ),
    )(p2d, t2d)

    intersection = jnp.sum(partials[:, 0])
    union = jnp.sum(partials[:, 1])
    dice = (2.0 * intersection + 1e-05) / (union + 1e-05)
    return 1.0 - dice


def dice_loss_ref(predicted, target):
    predicted = predicted.astype(jnp.float32)
    target = target.astype(jnp.float32)
    intersection = jnp.sum(predicted * target)
    union = jnp.sum(predicted) + jnp.sum(target)
    dice = (2.0 * intersection + 1e-05) / (union + 1e-05)
    return 1.0 - dice


if __name__ == "__main__":
    key = jax.random.PRNGKey(0)
    k1, k2 = jax.random.split(key)

    # Small NCHW-shaped inputs: predicted probabilities and binary targets.
    shape = (2, 4, 16, 16)
    predicted = jax.nn.sigmoid(jax.random.normal(k1, shape, dtype=jnp.float32))
    target = (jax.random.uniform(k2, shape) > 0.5).astype(jnp.float32)

    loss = dice_loss(predicted, target)
    jax.block_until_ready(loss)

    ref = dice_loss_ref(predicted, target)
    assert jnp.allclose(loss, ref, atol=1e-5, rtol=1e-4), (loss, ref)

    print("KERNEL_OK")
</pallas_src>

<mosaic_0001>
module attributes {stable_mosaic.version = 11 : i64} {
  func.func @kernel(%arg0: i32, %arg1: i32, %arg2: memref<128x16xf32, #tpu.memory_space<vmem>>, %arg3: memref<128x16xf32, #tpu.memory_space<vmem>>, %arg4: memref<1x2x1x16xf32, #tpu.memory_space<vmem>>) attributes {dimension_semantics = [#tpu.dimension_semantics<parallel>, #tpu.dimension_semantics<arbitrary>], iteration_bounds = array<i64: 1, 1>, scalar_prefetch = 0 : i64, scratch_operands = 0 : i64, tpu.core_type = #tpu.core_type<tc>, window_params = [{transform_indices = @transform_0, window_bounds = array<i64: 128, 16>}, {transform_indices = @transform_1, window_bounds = array<i64: 128, 16>}, {transform_indices = @transform_2, window_bounds = array<i64: 1, 2, 1, 16>}]} {
    %c0_i32 = arith.constant 0 : i32
    %0 = arith.cmpi eq, %arg1, %c0_i32 : i32
    %1 = arith.extui %0 : i1 to i32
    %c0_i32_0 = arith.constant 0 : i32
    %2 = arith.cmpi ne, %1, %c0_i32_0 : i32
    scf.if %2 {
      %cst_21 = arith.constant 0.000000e+00 : f32
      %25 = vector.broadcast %cst_21 : f32 to vector<1x2x1x16xf32>
      %c0_22 = arith.constant 0 : index
      %c0_23 = arith.constant 0 : index
      %c0_24 = arith.constant 0 : index
      %c0_25 = arith.constant 0 : index
      %26 = vector.load %arg4[%c0_22, %c0_23, %c0_24, %c0_25] : memref<1x2x1x16xf32, #tpu.memory_space<vmem>>, vector<1x2x1x16xf32>
      tpu.vector_store %arg4[%c0_22, %c0_23, %c0_24, %c0_25], %25 {strides = array<i32>} : memref<1x2x1x16xf32, #tpu.memory_space<vmem>>, vector<1x2x1x16xf32>,
    } else {
    }
    %c0 = arith.constant 0 : index
    %c0_1 = arith.constant 0 : index
    %3 = vector.load %arg2[%c0, %c0_1] : memref<128x16xf32, #tpu.memory_space<vmem>>, vector<128x16xf32>
    %c0_2 = arith.constant 0 : index
    %c0_3 = arith.constant 0 : index
    %4 = vector.load %arg3[%c0_2, %c0_3] : memref<128x16xf32, #tpu.memory_space<vmem>>, vector<128x16xf32>
    %c0_4 = arith.constant 0 : index
    %c0_5 = arith.constant 0 : index
    %c0_6 = arith.constant 0 : index
    %c0_7 = arith.constant 0 : index
    %5 = vector.load %arg4[%c0_4, %c0_5, %c0_6, %c0_7] : memref<1x2x1x16xf32, #tpu.memory_space<vmem>>, vector<1x1x1x16xf32>
    %6 = vector.shape_cast %5 : vector<1x1x1x16xf32> to vector<1x16xf32>
    %7 = arith.mulf %3, %4 : vector<128x16xf32>
    %cst = arith.constant dense<0.000000e+00> : vector<16xf32>
    %8 = vector.multi_reduction <add>, %7, %cst [0] : vector<128x16xf32> to vector<16xf32>
    %9 = vector.shape_cast %8 : vector<16xf32> to vector<1x16xf32>
    %10 = arith.addf %6, %9 : vector<1x16xf32>
    %c0_8 = arith.constant 0 : index
    %c0_9 = arith.constant 0 : index
    %c0_10 = arith.constant 0 : index
    %c0_11 = arith.constant 0 : index
    %11 = vector.load %arg4[%c0_8, %c0_9, %c0_10, %c0_11] : memref<1x2x1x16xf32, #tpu.memory_space<vmem>>, vector<1x1x1x16xf32>
    %12 = vector.shape_cast %11 : vector<1x1x1x16xf32> to vector<1x16xf32>
    %13 = vector.shape_cast %10 : vector<1x16xf32> to vector<1x1x1x16xf32>
    tpu.vector_store %arg4[%c0_8, %c0_9, %c0_10, %c0_11], %13 {strides = array<i32>} : memref<1x2x1x16xf32, #tpu.memory_space<vmem>>, vector<1x1x1x16xf32>,
    %c0_12 = arith.constant 0 : index
    %c1 = arith.constant 1 : index
    %c0_13 = arith.constant 0 : index
    %c0_14 = arith.constant 0 : index
    %14 = vector.load %arg4[%c0_12, %c1, %c0_13, %c0_14] : memref<1x2x1x16xf32, #tpu.memory_space<vmem>>, vector<1x1x1x16xf32>
    %15 = vector.shape_cast %14 : vector<1x1x1x16xf32> to vector<1x16xf32>
    %cst_15 = arith.constant dense<0.000000e+00> : vector<16xf32>
    %16 = vector.multi_reduction <add>, %3, %cst_15 [0] : vector<128x16xf32> to vector<16xf32>
    %17 = vector.shape_cast %16 : vector<16xf32> to vector<1x16xf32>
    %cst_16 = arith.constant dense<0.000000e+00> : vector<16xf32>
    %18 = vector.multi_reduction <add>, %4, %cst_16 [0] : vector<128x16xf32> to vector<16xf32>
    %19 = vector.shape_cast %18 : vector<16xf32> to vector<1x16xf32>
    %20 = arith.addf %17, %19 : vector<1x16xf32>
    %21 = arith.addf %15, %20 : vector<1x16xf32>
    %c0_17 = arith.constant 0 : index
    %c1_18 = arith.constant 1 : index
    %c0_19 = arith.constant 0 : index
    %c0_20 = arith.constant 0 : index
    %22 = vector.load %arg4[%c0_17, %c1_18, %c0_19, %c0_20] : memref<1x2x1x16xf32, #tpu.memory_space<vmem>>, vector<1x1x1x16xf32>
    %23 = vector.shape_cast %22 : vector<1x1x1x16xf32> to vector<1x16xf32>
    %24 = vector.shape_cast %21 : vector<1x16xf32> to vector<1x1x1x16xf32>
    tpu.vector_store %arg4[%c0_17, %c1_18, %c0_19, %c0_20], %24 {strides = array<i32>} : memref<1x2x1x16xf32, #tpu.memory_space<vmem>>, vector<1x1x1x16xf32>,
    return
  }
  func.func @transform_0(%arg0: i32, %arg1: i32) -> (i32, i32) {
    %c1_i32 = arith.constant 1 : i32
    %0 = arith.muli %arg0, %c1_i32 : i32
    %1 = arith.addi %0, %arg1 : i32
    %c0_i32 = arith.constant 0 : i32
    %c0_i32_0 = arith.constant 0 : i32
    return %1, %c0_i32 : i32, i32
  }
  func.func @transform_1(%arg0: i32, %arg1: i32) -> (i32, i32) {
    %c1_i32 = arith.constant 1 : i32
    %0 = arith.muli %arg0, %c1_i32 : i32
    %1 = arith.addi %0, %arg1 : i32
    %c0_i32 = arith.constant 0 : i32
    %c0_i32_0 = arith.constant 0 : i32
    return %1, %c0_i32 : i32, i32
  }
  func.func @transform_2(%arg0: i32, %arg1: i32) -> (i32, i32, i32, i32) {
    %c0_i32 = arith.constant 0 : i32
    %c0_i32_0 = arith.constant 0 : i32
    %c0_i32_1 = arith.constant 0 : i32
    %c0_i32_2 = arith.constant 0 : i32
    return %arg0, %c0_i32, %c0_i32_0, %c0_i32_1 : i32, i32, i32, i32
  }
}

</mosaic_0001>

<bundles_post_ra>
// kernel: dice_loss.1
= control target key start
LH: loop header
LB: loop body
LE: loop exit
PB: predicated region body
PF: predicated region fallthrough
CT: control target
= control target key end

     0   :  { %7 = vsyncpa [#allocation3], 0  ;;  %s402_s0 = inlined_call_operand.hbm [shape: f32[128,16], index: 0, kind: input, shape index: {}]   ;;  %s403_s1 = inlined_call_operand.hbm [shape: f32[128,16], index: 1, kind: input, shape index: {}]   ;;  %s404_s2 = inlined_call_operand.vmem [shape: f32[1,2,1,16], index: 2, kind: output, shape index: {}]  }
   0x1   :  { %8 = vsyncpa [#allocation5], 0  ;;  %s288_s9 = smov [#allocation2]   ;;  %s240_s13 = scalar_lea.hbm %s402_s0, 2048 }
   0x2   :  { %s18_s10 = sshll.u32 %s288_s9, 4  ;;  %p241_p0 = scmp.ne.s32.totalorder %s402_s0, %s240_s13  ;;  %s19_s10 = int_to_ptr.vmem [resolvable:$true] %s18_s10 }
   0x3   :  { %p244_p1 = scmp.lt.u32.totalorder %s240_s13, %s402_s0 }
   0x5   :  { %p246_p2 = pnand %p244_p1, %p241_p0 }
   0x7   :  { %249 = shalt.err (!%p246_p2)
}
   0x8   :  { %s250_s18 = scalar_lea.vmem %s19_s10, 2048  ;;  %p255_p4 = scmp.lt.s32.totalorder %s19_s10, %s19_s10 }
   0x9   :  { %p251_p3 = scmp.ne.s32.totalorder %s19_s10, %s250_s18  ;;  %p256_p5 = scmp.lt.s32.totalorder %s250_s18, %s250_s18 }
   0xb   :  { %p257_p6 = por %p256_p5, %p255_p4 }
   0xd   :  { %p258_p7 = pnand %p257_p6, %p251_p3 }
   0xf   :  { %261 = shalt.err (!%p258_p7)
}
  0x10   :  { %s289_s19 = smov 128   ;;  %s290_s20 = smov 8  }
  0x11   :  { %24 = dma.hbm_to_vmem [thread:$0]  %s402_s0, 2048, %s19_s10, [#allocation3], %s289_s19, %s289_s19, %s290_s20  }
  0x12   :  { %s291_s23 = smov [#allocation4]   ;;  %s262_s27 = scalar_lea.hbm %s403_s1, 2048 }
  0x13   :  { %s34_s24 = sshll.u32 %s291_s23, 4  ;;  %p263_p8 = scmp.ne.s32.totalorder %s403_s1, %s262_s27  ;;  %s35_s24 = int_to_ptr.vmem [resolvable:$true] %s34_s24 }
  0x14   :  { %p266_p9 = scmp.lt.u32.totalorder %s262_s27, %s403_s1 }
  0x16   :  { %p268_p10 = pnand %p266_p9, %p263_p8 }
  0x18   :  { %271 = shalt.err (!%p268_p10)
}
  0x19   :  { %s272_s4 = scalar_lea.vmem %s35_s24, 2048  ;;  %p277_p12 = scmp.lt.s32.totalorder %s35_s24, %s35_s24 }
  0x1a   :  { %p273_p11 = scmp.ne.s32.totalorder %s35_s24, %s272_s4  ;;  %p278_p13 = scmp.lt.s32.totalorder %s272_s4, %s272_s4 }
  0x1c   :  { %p279_p0 = por %p278_p13, %p277_p12 }
  0x1e   :  { %p280_p1 = pnand %p279_p0, %p273_p11 }
  0x20   :  { %283 = shalt.err (!%p280_p1)
}
  0x21   :  { %40 = dma.hbm_to_vmem [thread:$0]  %s403_s1, 2048, %s35_s24, [#allocation5], %s289_s19, %s289_s19, %s290_s20  }
  0x22   :  { %284 = dma.done.wait [#allocation3], 2048  }
  0x23   :  { %285 = vsyncadd [#allocation3], 4294965248 }
  0x24   :  { %286 = dma.done.wait [#allocation5], 2048  }
  0x25   :  { %287 = vsyncadd [#allocation5], 4294965248  ;;  %vm55_vm0 = vcmask 122880   ;;  %v292_v0 = vmov 0.0   ;;  %vm107_vm1 = vcmask 130048   ;;  %v58_v1 = vld [vmem:[#allocation2] sm:$0xff] }
  0x26   :  { %56 = vst.msk [vmem:[%s404_s2] sm:$0x1] %vm55_vm0, %v292_v0  ;;  %57 = vst.msk [vmem:[%s404_s2 + $0x1] sm:$0x1] %vm55_vm0, %v292_v0  ;;  %v59_v2 = vld [vmem:[#allocation2 + $0x8] sm:$0xff]  ;;  %v60_v3 = vld [vmem:[#allocation2 + $0x10] sm:$0xff] }
  0x27   :  { %v150_v4 = vsel %vm107_vm1, %v58_v1, 0.0  ;;  %v151_v5 = vsel %vm107_vm1, %v59_v2, 0.0  ;;  %v61_v7 = vld [vmem:[#allocation2 + $0x18] sm:$0xff]  ;;  %v153_v8 = vsel %vm107_vm1, %v60_v3, 0.0  ;;  %v62_v9 = vld [vmem:[#allocation2 + $0x20] sm:$0xff]  ;;  %v75_v11 = vld [vmem:[#allocation4 + $0x8] sm:$0xff] }
  0x28   :  { %v152_v6 = vadd.f32 %v151_v5, %v150_v4  ;;  %v74_v10 = vld [vmem:[#allocation4] sm:$0xff]  ;;  %v76_v12 = vld [vmem:[#allocation4 + $0x10] sm:$0xff]  ;;  %v77_v13 = vld [vmem:[#allocation4 + $0x18] sm:$0xff]  ;;  %v92_v16 = vmul.f32 %v75_v11, %v59_v2  ;;  %v155_v23 = vsel %vm107_vm1, %v61_v7, 0.0  ;;  %v157_v36 = vsel %vm107_vm1, %v62_v9, 0.0 }
  0x29   :  { %v78_v14 = vld [vmem:[#allocation4 + $0x20] sm:$0xff]  ;;  %v91_v15 = vmul.f32 %v74_v10, %v58_v1  ;;  %v93_v17 = vmul.f32 %v76_v12, %v60_v3  ;;  %v94_v18 = vmul.f32 %v77_v13, %v61_v7  ;;  %v63_v20 = vld [vmem:[#allocation2 + $0x28] sm:$0xff]  ;;  %v64_v26 = vld [vmem:[#allocation2 + $0x30] sm:$0xff]  ;;  %v187_v39 = vsel %vm107_vm1, %v74_v10, 0.0 }
  0x2a   :  { %v154_v19 = vadd.f32 %v153_v8, %v152_v6  ;;  %v79_v21 = vld [vmem:[#allocation4 + $0x28] sm:$0xff]  ;;  %v95_v24 = vmul.f32 %v78_v14, %v62_v9  ;;  %v109_v25 = vsel %vm107_vm1, %v92_v16, 0.0  ;;  %v80_v27 = vld [vmem:[#allocation4 + $0x30] sm:$0xff]  ;;  %v65_v33 = vld [vmem:[#allocation2 + $0x38] sm:$0xff]  ;;  %v159_v43 = vsel %vm107_vm1, %v63_v20, 0.0 }
  0x2b   :  { %v108_v22 = vsel %vm107_vm1, %v91_v15, 0.0  ;;  %v96_v29 = vmul.f32 %v79_v21, %v63_v20  ;;  %v111_v30 = vsel %vm107_vm1, %v93_v17, 0.0  ;;  %v113_v31 = vsel %vm107_vm1, %v94_v18, 0.0  ;;  %v81_v34 = vld [vmem:[#allocation4 + $0x38] sm:$0xff]  ;;  %v66_v40 = vld [vmem:[#allocation2 + $0x40] sm:$0xff]  ;;  %v67_v48 = vld [vmem:[#allocation2 + $0x48] sm:$0xff] }
  0x2c   :  { %v110_v28 = vadd.f32 %v109_v25, %v108_v22  ;;  %v156_v32 = vadd.f32 %v155_v23, %v154_v19  ;;  %v97_v37 = vmul.f32 %v80_v27, %v64_v26  ;;  %v115_v38 = vsel %vm107_vm1, %v95_v24, 0.0  ;;  %v82_v41 = vld [vmem:[#allocation4 + $0x40] sm:$0xff]  ;;  %v83_v49 = vld [vmem:[#allocation4 + $0x48] sm:$0xff]  ;;  %v68_v58 = vld [vmem:[#allocation2 + $0x50] sm:$0xff] }
  0x2d   :  { %v98_v44 = vmul.f32 %v81_v34, %v65_v33  ;;  %v117_v45 = vsel %vm107_vm1, %v96_v29, 0.0  ;;  %v188_v47 = vsel %vm107_vm1, %v75_v11, 0.0  ;;  %v161_v51 = vsel %vm107_vm1, %v64_v26, 0.0  ;;  %v84_v59 = vld [vmem:[#allocation4 + $0x50] sm:$0xff]  ;;  %v69_v3 = vld [vmem:[#allocation2 + $0x58] sm:$0xff]  ;;  %v71_v22 = vld [vmem:[#allocation2 + $0x68] sm:$0xff] }
  0x2e   :  { %v112_v35 = vadd.f32 %v111_v30, %v110_v28  ;;  %v158_v46 = vadd.f32 %v157_v36, %v156_v32  ;;  %v189_v52 = vadd.f32 %v188_v47, %v187_v39  ;;  %v190_v53 = vsel %vm107_vm1, %v76_v12, 0.0  ;;  %v85_v4 = vld [vmem:[#allocation4 + $0x58] sm:$0xff]  ;;  %v70_v12 = vld [vmem:[#allocation2 + $0x60] sm:$0xff]  ;;  %v87_v23 = vld [vmem:[#allocation4 + $0x68] sm:$0xff] }
  0x2f   :  { %v99_v54 = vmul.f32 %v82_v41, %v66_v40  ;;  %v119_v55 = vsel %vm107_vm1, %v97_v37, 0.0  ;;  %v192_v57 = vsel %vm107_vm1, %v77_v13, 0.0  ;;  %v163_v61 = vsel %vm107_vm1, %v65_v33, 0.0  ;;  %v86_v13 = vld [vmem:[#allocation4 + $0x60] sm:$0xff]  ;;  %v88_v32 = vld [vmem:[#allocation4 + $0x70] sm:$0xff] }
  0x30   :  { %v114_v42 = vadd.f32 %v113_v31, %v112_v35  ;;  %v160_v56 = vadd.f32 %v159_v43, %v158_v46  ;;  %v191_v62 = vadd.f32 %v190_v53, %v189_v52  ;;  %v100_v63 = vmul.f32 %v83_v49, %v67_v48  ;;  %v72_v31 = vld [vmem:[#allocation2 + $0x70] sm:$0xff] }
  0x31   :  { %v121_v0 = vsel %vm107_vm1, %v98_v44, 0.0  ;;  %v194_v2 = vsel %vm107_vm1, %v78_v14, 0.0  ;;  %v165_v6 = vsel %vm107_vm1, %v66_v40, 0.0  ;;  %v101_v8 = vmul.f32 %v84_v59, %v68_v58  ;;  %v73_v40 = vld [vmem:[#allocation2 + $0x78] sm:$0xff] }
  0x32   :  { %v116_v50 = vadd.f32 %v115_v38, %v114_v42  ;;  %v162_v1 = vadd.f32 %v161_v51, %v160_v56  ;;  %v193_v7 = vadd.f32 %v192_v57, %v191_v62  ;;  %v123_v9 = vsel %vm107_vm1, %v99_v54, 0.0  ;;  %v89_v42 = vld [vmem:[#allocation4 + $0x78] sm:$0xff] }
  0x33   :  { %v196_v11 = vsel %vm107_vm1, %v79_v21, 0.0  ;;  %v167_v16 = vsel %vm107_vm1, %v67_v48, 0.0  ;;  %v102_v18 = vmul.f32 %v85_v4, %v69_v3  ;;  %v125_v14 = vsel %vm107_vm1, %v100_v63, 0.0 }
  0x34   :  { %v118_v60 = vadd.f32 %v117_v45, %v116_v50  ;;  %v164_v10 = vadd.f32 %v163_v61, %v162_v1  ;;  %v195_v17 = vadd.f32 %v194_v2, %v193_v7  ;;  %v198_v20 = vsel %vm107_vm1, %v80_v27, 0.0 }
  0x35   :  { %v169_v25 = vsel %vm107_vm1, %v68_v58, 0.0  ;;  %v103_v28 = vmul.f32 %v86_v13, %v70_v12  ;;  %v127_v21 = vsel %vm107_vm1, %v101_v8, 0.0  ;;  %v200_v30 = vsel %vm107_vm1, %v81_v34, 0.0 }
  0x36   :  { %v120_v5 = vadd.f32 %v119_v55, %v118_v60  ;;  %v166_v19 = vadd.f32 %v165_v6, %v164_v10  ;;  %v197_v26 = vadd.f32 %v196_v11, %v195_v17  ;;  %v171_v35 = vsel %vm107_vm1, %v69_v3, 0.0 }
  0x37   :  { %v104_v37 = vmul.f32 %v87_v23, %v71_v22  ;;  %v129_v27 = vsel %vm107_vm1, %v102_v18, 0.0  ;;  %v202_v39 = vsel %vm107_vm1, %v82_v41, 0.0  ;;  %v173_v44 = vsel %vm107_vm1, %v70_v12, 0.0 }
  0x38   :  { %v122_v15 = vadd.f32 %v121_v0, %v120_v5  ;;  %v168_v29 = vadd.f32 %v167_v16, %v166_v19  ;;  %v199_v36 = vadd.f32 %v198_v20, %v197_v26  ;;  %v105_v46 = vmul.f32 %v88_v32, %v72_v31  ;;  %v90_v26 = vld [vmem:[%s404_s2] sm:$0x1] }
  0x39   :  { %v131_v34 = vsel %vm107_vm1, %v103_v28, 0.0  ;;  %v204_v48 = vsel %vm107_vm1, %v83_v49, 0.0  ;;  %v175_v51 = vsel %vm107_vm1, %v71_v22, 0.0  ;;  %v106_v53 = vmul.f32 %v89_v42, %v73_v40 }
  0x3a   :  { %v124_v24 = vadd.f32 %v123_v9, %v122_v15  ;;  %v170_v38 = vadd.f32 %v169_v25, %v168_v29  ;;  %v201_v45 = vadd.f32 %v200_v30, %v199_v36  ;;  %v133_v54 = vsel %vm107_vm1, %v104_v37, 0.0  ;;  %v233_v36 = vld [vmem:[%s404_s2 + $0x1] sm:$0x1] }
  0x3b   :  { %v206_v55 = vsel %vm107_vm1, %v84_v59, 0.0  ;;  %v177_v57 = vsel %vm107_vm1, %v72_v31, 0.0  ;;  %v135_v60 = vsel %vm107_vm1, %v105_v46, 0.0  ;;  %v208_v62 = vsel %vm107_vm1, %v85_v4, 0.0 }
  0x3c   :  { %v126_v33 = vadd.f32 %v125_v14, %v124_v24  ;;  %v172_v47 = vadd.f32 %v171_v35, %v170_v38  ;;  %v203_v52 = vadd.f32 %v202_v39, %v201_v45  ;;  %v179_v63 = vsel %vm107_vm1, %v73_v40, 0.0 }
  0x3d   :  { %v137_v1 = vsel %vm107_vm1, %v106_v53, 0.0  ;;  %v210_v3 = vsel %vm107_vm1, %v86_v13, 0.0  ;;  %v212_v7 = vsel %vm107_vm1, %v87_v23, 0.0  ;;  %v214_v11 = vsel %vm107_vm1, %v88_v32, 0.0 }
  0x3e   :  { %v128_v43 = vadd.f32 %v127_v21, %v126_v33  ;;  %v174_v41 = vadd.f32 %v173_v44, %v172_v47  ;;  %v205_v58 = vadd.f32 %v204_v48, %v203_v52  ;;  %v216_v16 = vsel %vm107_vm1, %v89_v42, 0.0 }
  0x40   :  { %v130_v50 = vadd.f32 %v129_v27, %v128_v43  ;;  %v176_v61 = vadd.f32 %v175_v51, %v174_v41  ;;  %v207_v0 = vadd.f32 %v206_v55, %v205_v58 }
  0x42   :  { %v132_v56 = vadd.f32 %v131_v34, %v130_v50  ;;  %v178_v2 = vadd.f32 %v177_v57, %v176_v61  ;;  %v209_v59 = vadd.f32 %v208_v62, %v207_v0 }
  0x44   :  { %v134_v49 = vadd.f32 %v133_v54, %v132_v56  ;;  %v180_v6 = vadd.f32 %v179_v63, %v178_v2  ;;  %v211_v9 = vadd.f32 %v210_v3, %v209_v59 }
  0x46   :  { %v136_v5 = vadd.f32 %v135_v60, %v134_v49  ;;  %v181_v10 = vrot.slane %v180_v6, 4  ;;  %v213_v12 = vadd.f32 %v212_v7, %v211_v9 }
  0x48   :  { %v138_v8 = vadd.f32 %v137_v1, %v136_v5  ;;  %v182_v15 = vadd.f32 %v181_v10, %v180_v6  ;;  %v215_v18 = vadd.f32 %v214_v11, %v213_v12 }
  0x4a   :  { %v139_v4 = vrot.slane %v138_v8, 4  ;;  %v183_v14 = vrot.slane %v182_v15, 2  ;;  %v217_v13 = vadd.f32 %v216_v16, %v215_v18 }
  0x4c   :  { %v140_v17 = vadd.f32 %v139_v4, %v138_v8  ;;  %v184_v22 = vadd.f32 %v183_v14, %v182_v15  ;;  %v218_v24 = vrot.slane %v217_v13, 4 }
  0x4e   :  { %v141_v19 = vrot.slane %v140_v17, 2  ;;  %v219_v23 = vadd.f32 %v218_v24, %v217_v13  ;;  %v185_v21 = vrot.slane %v184_v22, 1 }
  0x50   :  { %v142_v20 = vadd.f32 %v141_v19, %v140_v17  ;;  %v220_v29 = vrot.slane %v219_v23, 2  ;;  %v186_v32 = vadd.f32 %v185_v21, %v184_v22 }
  0x52   :  { %v143_v25 = vrot.slane %v142_v20, 1  ;;  %v221_v31 = vadd.f32 %v220_v29, %v219_v23 }
  0x54   :  { %v144_v28 = vadd.f32 %v143_v25, %v142_v20  ;;  %v222_v33 = vrot.slane %v221_v31, 1 }
  0x56   :  { %v145_v30 = vadd.f32 %v144_v28, %v90_v26  ;;  %v223_v35 = vadd.f32 %v222_v33, %v221_v31 }
  0x58   :  { %147 = vst.msk [vmem:[%s404_s2] sm:$0x1] %vm55_vm0, %v145_v30  ;;  %v224_v37 = vadd.f32 %v223_v35, %v186_v32 }
  0x5a   :  { %v225_v27 = vadd.f32 %v233_v36, %v224_v37 }
  0x5c   :  { %234 = vst.msk [vmem:[%s404_s2 + $0x1] sm:$0x1] %vm55_vm0, %v225_v27 }
  0x5d   :  { %231 = vsyncpa [#allocation3], 1 }
  0x5e   :  { %232 = vsyncpa [#allocation5], 1 }

</bundles_post_ra>
